<compile_context>
chip_gen: v5e
topology: v5e:2x2
jax: 0.10.0
libtpu: 0.0.40
codegen_flags: <defaults>
</compile_context>

<pallas_src>
from functools import partial

import numpy as np

import jax
import jax.numpy as jnp
from jax.experimental import pallas as pl
from jax.experimental.pallas import tpu as pltpu


def _tap_masks(height, width):
    """(9, H*W) f32 validity masks for the 9 taps of a 3x3 / pad=1 conv."""
    hw = height * width
    rows = np.repeat(np.arange(height), width)
    cols = np.tile(np.arange(width), height)
    masks = np.zeros((9, hw), np.float32)
    for kh in range(3):
        for kw in range(3):
            dh, dw = kh - 1, kw - 1
            ok = ((rows + dh >= 0) & (rows + dh < height) &
                  (cols + dw >= 0) & (cols + dw < width))
            masks[kh * 3 + kw] = ok.astype(np.float32)
    return jnp.asarray(masks)


def _v3conv_kernel(x_ref, w_ref, mask_ref, scale_ref, bias_ref, o_ref, col_ref,
                   *, cin, height, width, batch_tile, fuse_shuffle):
    # x_ref:     (bt, Cfull, HW) f32  bt input images (first `cin` channels
    #                                 feed the binary conv; all Cfull channels
    #                                 are the idle passthrough when fused).
    # w_ref:     (Cout, 9*cin)  bf16  binarized (+-1 / 0) weights, tap-major.
    # mask_ref:  (9, HW)        f32   per-tap zero-padding boundary masks.
    # scale_ref: (Cout, 1)      f32   alpha * gamma / sqrt(var + eps)
    # bias_ref:  (Cout, 1)      f32   beta - mean * gamma / sqrt(var + eps)
    # o_ref:     fused  : (bt, Cout, 2*HW)  rows are [conv_k | idle_k]
    #            general: (bt, Cout, HW)
    # col_ref:   (9*cin, bt*HW) bf16  im2col operand scratch (VMEM).
    hw = height * width
    masks = mask_ref[...]                            # (9, HW) f32, resident
    mask_rows = [masks[t:t + 1, :] for t in range(9)]

    # Build the im2col operand: per tap, a lane-rolled copy of the activation
    # with wrapped / out-of-image elements zeroed by the tap mask, written
    # straight into the bf16 scratch.  All shifts / offsets are static.
    for i in range(batch_tile):
        x_img = x_ref[i]                             # (Cfull, HW) f32
        x_act = x_img[:cin, :]                       # (cin, HW)  f32
        for t in range(9):
            dh, dw = t // 3 - 1, t % 3 - 1
            s = dh * width + dw                      # flattened-tap shift
            if s == 0:
                win = x_act                          # centre tap: mask is all-ones
            else:
                win = pltpu.roll(x_act, shift=(-s) % hw, axis=1) * mask_rows[t]
            col_ref[pl.ds(t * cin, cin), pl.ds(i * hw, hw)] = (
                win.astype(jnp.bfloat16))
        if fuse_shuffle:
            # Idle passthrough: second HW lanes of every output row.
            o_ref[i, :, pl.ds(hw, hw)] = x_img.astype(o_ref.dtype)

    # One fused MXU matmul over all bt images of this grid step:
    #   (Cout, 9*cin) @ (9*cin, bt*HW) -> f32 (Cout, bt*HW).
    acc = jnp.dot(w_ref[...], col_ref[...], preferred_element_type=jnp.float32)

    # Folded (inference) batchnorm + hardtanh in f32, lane-dense.
    y = jnp.clip(acc * scale_ref[...] + bias_ref[...], -1.0, 1.0)

    for i in range(batch_tile):
        y_img = y[:, i * hw:(i + 1) * hw].astype(o_ref.dtype)
        if fuse_shuffle:
            o_ref[i, :, pl.ds(0, hw)] = y_img
        else:
            o_ref[i] = y_img


def _pick_batch_tile(n, hw, *, target_lanes=512, max_lanes=2048, max_tile=8):
    """Images per grid step: widen the streamed MXU / lane dim for small HW,
    but keep >=2 grid steps (pipeline / both TensorCores) when possible."""
    cands = [d for d in range(1, min(n, max_tile) + 1)
             if n % d == 0 and d * hw <= max_lanes]
    if not cands:
        return 1
    multi = [d for d in cands if n // d >= 2]
    pool = multi if multi else cands
    for d in pool:
        if d * hw >= target_lanes:
            return d
    return pool[-1]


def _conv_bn_htanh(x_flat, w_mat, masks, scale, bias, *, cin, height, width,
                   fuse_shuffle):
    n, cfull, hw = x_flat.shape
    cout = w_mat.shape[0]
    out_lanes = 2 * hw if fuse_shuffle else hw
    bt = _pick_batch_tile(n, hw)

    kernel = partial(_v3conv_kernel, cin=cin, height=height, width=width,
                     batch_tile=bt, fuse_shuffle=fuse_shuffle)

    # Rough VMEM budget: double-buffered blocks + resident constants + scratch.
    est = 2 * (bt * cfull * hw * 4 + bt * cout * out_lanes * 4
               + int(w_mat.size) * 2 + int(masks.size) * 4 + 2 * cout * 4) \
        + 9 * cin * bt * hw * 2
    vmem_limit = int(min(48 * 2**20, max(32 * 2**20, 2 * est)))

    return pl.pallas_call(
        kernel,
        out_shape=jax.ShapeDtypeStruct((n, cout, out_lanes), jnp.float32),
        grid_spec=pltpu.PrefetchScalarGridSpec(
            num_scalar_prefetch=0,
            grid=(n // bt,),            # batch tiles = pipeline / megacore axis
            in_specs=[
                pl.BlockSpec((bt, cfull, hw), lambda b: (b, 0, 0)),
                pl.BlockSpec((cout, w_mat.shape[1]), lambda b: (0, 0)),
                pl.BlockSpec((9, hw), lambda b: (0, 0)),
                pl.BlockSpec((cout, 1), lambda b: (0, 0)),
                pl.BlockSpec((cout, 1), lambda b: (0, 0)),
            ],
            out_specs=pl.BlockSpec((bt, cout, out_lanes), lambda b: (b, 0, 0)),
            scratch_shapes=[pltpu.VMEM((9 * cin, bt * hw), jnp.bfloat16)],
        ),
        compiler_params=pltpu.CompilerParams(
            dimension_semantics=("parallel",),
            vmem_limit_bytes=vmem_limit),
    )(x_flat, w_mat, masks, scale, bias)


def channel_shuffle(x_nchw, groups):
    b, c, h, w = x_nchw.shape
    assert c % groups == 0
    x = x_nchw.reshape(b, groups, c // groups, h, w)
    x = jnp.transpose(x, (0, 2, 1, 3, 4))
    return x.reshape(b, c, h, w)


class V3ConvParams:
    """Deterministic parameter init mirroring v3conv.__init__ shapes."""

    def __init__(self, inplanes, planes, key):
        self.inplanes = inplanes
        self.planes = planes
        # Conv weight (planes, inplanes, 3, 3), no bias (binarized in forward).
        self.w = jax.random.normal(key, (planes, inplanes, 3, 3),
                                   jnp.float32) * 0.1
        # BatchNorm2d(planes) params + running stats (inference mode), folded
        # into per-channel scale/bias.
        gamma = 1.0 + 0.1 * jnp.arange(planes, dtype=jnp.float32)
        beta = 0.05 * jnp.arange(planes, dtype=jnp.float32)
        running_mean = 0.01 * jnp.arange(planes, dtype=jnp.float32)
        running_var = jnp.ones((planes,), jnp.float32)
        eps = 1e-5
        self.bn_scale = gamma / jnp.sqrt(running_var + eps)
        self.bn_bias = beta - running_mean * self.bn_scale
        # LearnableBias(planes) exists in __init__ but is unused in forward().
        self.shift_bias = jnp.zeros((1, planes, 1, 1), jnp.float32)


def v3conv_forward(params, x_nchw, pooling=False, groups_num=2):
    assert not pooling, "pooling=True branch not implemented"
    n, c, height, width = x_nchw.shape
    inplanes, planes = params.inplanes, params.planes
    assert c == 2 * inplanes
    hw = height * width

    # BinarizeConv2d (XNOR-style): w_bin = sign(w) * mean|w| (per out channel).
    # alpha is folded into the BN scale so the MXU sees exact {-1,0,+1} bf16.
    alpha = jnp.mean(jnp.abs(params.w), axis=(1, 2, 3))              # (Cout,)
    w_sign = jnp.sign(params.w)                                      # f32 +-1/0
    w_mat = jnp.transpose(w_sign, (0, 2, 3, 1)).reshape(planes, 9 * inplanes)
    w_mat = w_mat.astype(jnp.bfloat16)

    eff_scale = (alpha * params.bn_scale).reshape(planes, 1).astype(jnp.float32)
    eff_bias = params.bn_bias.reshape(planes, 1).astype(jnp.float32)
    masks = _tap_masks(height, width)

    x_flat = x_nchw.reshape(n, c, hw)          # free reshape, stays NCHW

    if groups_num == 2 and planes == c:
        # Fast path: concat + channel_shuffle fused into the kernel's output
        # layout; the interleave is realized by a free row-major reshape.
        out = _conv_bn_htanh(x_flat, w_mat, masks, eff_scale, eff_bias,
                             cin=inplanes, height=height, width=width,
                             fuse_shuffle=True)
        return out.reshape(n, 2 * planes, height, width)

    # General fallback (planes != 2*inplanes or groups_num != 2):
    # conv+bn+hardtanh in the kernel, cat/shuffle as (cheap) JAX glue.
    out = _conv_bn_htanh(x_flat, w_mat, masks, eff_scale, eff_bias,
                         cin=inplanes, height=height, width=width,
                         fuse_shuffle=False)
    out = out.reshape(n, planes, height, width)
    out = jnp.concatenate([out, x_nchw], axis=1)
    if groups_num > 1:
        out = channel_shuffle(out, groups_num)
    return out


if __name__ == "__main__":
    inplanes, planes = 4, 8
    height, width = 16, 16
    key = jax.random.PRNGKey(0)
    k_x, k_p, k_x2 = jax.random.split(key, 3)
    params = V3ConvParams(inplanes, planes, k_p)

    def reference(x):
        # Plain-JAX f32 reference with the module's semantics.
        alpha = jnp.mean(jnp.abs(params.w), axis=(1, 2, 3), keepdims=True)
        w_bin = jnp.sign(params.w) * alpha
        r = jax.lax.conv_general_dilated(
            x[:, :inplanes], w_bin, window_strides=(1, 1),
            padding=((1, 1), (1, 1)),
            dimension_numbers=("NCHW", "OIHW", "NCHW"))
        r = r * params.bn_scale[None, :, None, None] + \
            params.bn_bias[None, :, None, None]
        r = jnp.clip(r, -1.0, 1.0)
        r = jnp.concatenate([r, x], axis=1)
        return channel_shuffle(r, 2)

    fwd = jax.jit(lambda xx: v3conv_forward(params, xx, pooling=False,
                                            groups_num=2))

    # batch=2: one image per grid step (grid=(2,), both TensorCores busy).
    x = jax.random.normal(k_x, (2, 2 * inplanes, height, width), jnp.float32)
    out = jax.block_until_ready(fwd(x))
    ref = reference(x)
    assert out.shape == (2, 2 * planes, height, width) == ref.shape
    # Kernel uses bf16 matmul operands (f32 accumulation) vs the f32 reference.
    err = float(jnp.max(jnp.abs(out - ref)))
    assert err < 3e-2, f"max |kernel - ref| = {err}"

    # batch=8: exercises the batch-tiled grid path (2 images per grid step).
    x8 = jax.random.normal(k_x2, (8, 2 * inplanes, height, width), jnp.float32)
    out8 = jax.block_until_ready(fwd(x8))
    ref8 = reference(x8)
    assert out8.shape == ref8.shape
    err8 = float(jnp.max(jnp.abs(out8 - ref8)))
    assert err8 < 3e-2, f"max |kernel - ref| = {err8}"

    print("KERNEL_OK")
</pallas_src>

<mosaic_0001>
module attributes {stable_mosaic.version = 11 : i64} {
  func.func @_v3conv_kernel(%arg0: i32, %arg1: memref<1x8x256xf32, #tpu.memory_space<vmem>>, %arg2: memref<8x36xbf16, #tpu.memory_space<vmem>>, %arg3: memref<9x256xf32, #tpu.memory_space<vmem>>, %arg4: memref<8x1xf32, #tpu.memory_space<vmem>>, %arg5: memref<8x1xf32, #tpu.memory_space<vmem>>, %arg6: memref<1x8x512xf32, #tpu.memory_space<vmem>>, %arg7: memref<36x256xbf16, #tpu.memory_space<vmem>>) attributes {dimension_semantics = [#tpu.dimension_semantics<parallel>], iteration_bounds = array<i64: 2>, scalar_prefetch = 0 : i64, scratch_operands = 1 : i64, tpu.core_type = #tpu.core_type<tc>, window_params = [{transform_indices = @transform_0, window_bounds = array<i64: 1, 8, 256>}, {pipeline_mode = #tpu.pipeline_mode<synchronous>, transform_indices = @transform_1, window_bounds = array<i64: 8, 36>}, {pipeline_mode = #tpu.pipeline_mode<synchronous>, transform_indices = @transform_2, window_bounds = array<i64: 9, 256>}, {pipeline_mode = #tpu.pipeline_mode<synchronous>, transform_indices = @transform_3, window_bounds = array<i64: 8, 1>}, {pipeline_mode = #tpu.pipeline_mode<synchronous>, transform_indices = @transform_4, window_bounds = array<i64: 8, 1>}, {transform_indices = @transform_5, window_bounds = array<i64: 1, 8, 512>}]} {
    %c0 = arith.constant 0 : index
    %c0_0 = arith.constant 0 : index
    %0 = vector.load %arg3[%c0, %c0_0] : memref<9x256xf32, #tpu.memory_space<vmem>>, vector<9x256xf32>
    %1 = vector.extract_strided_slice %0 {offsets = [0, 0], sizes = [1, 256], strides = [1, 1]} : vector<9x256xf32> to vector<1x256xf32>
    %2 = vector.extract_strided_slice %0 {offsets = [1, 0], sizes = [1, 256], strides = [1, 1]} : vector<9x256xf32> to vector<1x256xf32>
    %3 = vector.extract_strided_slice %0 {offsets = [2, 0], sizes = [1, 256], strides = [1, 1]} : vector<9x256xf32> to vector<1x256xf32>
    %4 = vector.extract_strided_slice %0 {offsets = [3, 0], sizes = [1, 256], strides = [1, 1]} : vector<9x256xf32> to vector<1x256xf32>
    %5 = vector.extract_strided_slice %0 {offsets = [5, 0], sizes = [1, 256], strides = [1, 1]} : vector<9x256xf32> to vector<1x256xf32>
    %6 = vector.extract_strided_slice %0 {offsets = [6, 0], sizes = [1, 256], strides = [1, 1]} : vector<9x256xf32> to vector<1x256xf32>
    %7 = vector.extract_strided_slice %0 {offsets = [7, 0], sizes = [1, 256], strides = [1, 1]} : vector<9x256xf32> to vector<1x256xf32>
    %8 = vector.extract_strided_slice %0 {offsets = [8, 0], sizes = [1, 256], strides = [1, 1]} : vector<9x256xf32> to vector<1x256xf32>
    %c0_1 = arith.constant 0 : index
    %c0_2 = arith.constant 0 : index
    %c0_3 = arith.constant 0 : index
    %9 = vector.load %arg1[%c0_1, %c0_2, %c0_3] : memref<1x8x256xf32, #tpu.memory_space<vmem>>, vector<1x8x256xf32>
    %10 = vector.shape_cast %9 : vector<1x8x256xf32> to vector<8x256xf32>
    %11 = vector.extract_strided_slice %10 {offsets = [0, 0], sizes = [4, 256], strides = [1, 1]} : vector<8x256xf32> to vector<4x256xf32>
    %c17_i32 = arith.constant 17 : i32
    %12 = tpu.dynamic_rotate %11 by %c17_i32 dim 1 : vector<4x256xf32>, i32 -> vector<4x256xf32>
    %13 = vector.broadcast %1 : vector<1x256xf32> to vector<4x256xf32>
    %14 = arith.mulf %12, %13 : vector<4x256xf32>
    %15 = arith.truncf %14 : vector<4x256xf32> to vector<4x256xbf16>
    %c0_4 = arith.constant 0 : index
    %c0_5 = arith.constant 0 : index
    %16 = vector.load %arg7[%c0_4, %c0_5] : memref<36x256xbf16, #tpu.memory_space<vmem>>, vector<4x256xbf16>
    tpu.vector_store %arg7[%c0_4, %c0_5], %15 {strides = array<i32>} : memref<36x256xbf16, #tpu.memory_space<vmem>>, vector<4x256xbf16>,
    %c16_i32 = arith.constant 16 : i32
    %17 = tpu.dynamic_rotate %11 by %c16_i32 dim 1 : vector<4x256xf32>, i32 -> vector<4x256xf32>
    %18 = vector.broadcast %2 : vector<1x256xf32> to vector<4x256xf32>
    %19 = arith.mulf %17, %18 : vector<4x256xf32>
    %20 = arith.truncf %19 : vector<4x256xf32> to vector<4x256xbf16>
    %c4 = arith.constant 4 : index
    %c0_6 = arith.constant 0 : index
    %21 = vector.load %arg7[%c4, %c0_6] : memref<36x256xbf16, #tpu.memory_space<vmem>>, vector<4x256xbf16>
    tpu.vector_store %arg7[%c4, %c0_6], %20 {strides = array<i32>} : memref<36x256xbf16, #tpu.memory_space<vmem>>, vector<4x256xbf16>,
    %c15_i32 = arith.constant 15 : i32
    %22 = tpu.dynamic_rotate %11 by %c15_i32 dim 1 : vector<4x256xf32>, i32 -> vector<4x256xf32>
    %23 = vector.broadcast %3 : vector<1x256xf32> to vector<4x256xf32>
    %24 = arith.mulf %22, %23 : vector<4x256xf32>
    %25 = arith.truncf %24 : vector<4x256xf32> to vector<4x256xbf16>
    %c8 = arith.constant 8 : index
    %c0_7 = arith.constant 0 : index
    %26 = vector.load %arg7[%c8, %c0_7] : memref<36x256xbf16, #tpu.memory_space<vmem>>, vector<4x256xbf16>
    tpu.vector_store %arg7[%c8, %c0_7], %25 {strides = array<i32>} : memref<36x256xbf16, #tpu.memory_space<vmem>>, vector<4x256xbf16>,
    %c1_i32 = arith.constant 1 : i32
    %27 = tpu.dynamic_rotate %11 by %c1_i32 dim 1 : vector<4x256xf32>, i32 -> vector<4x256xf32>
    %28 = vector.broadcast %4 : vector<1x256xf32> to vector<4x256xf32>
    %29 = arith.mulf %27, %28 : vector<4x256xf32>
    %30 = arith.truncf %29 : vector<4x256xf32> to vector<4x256xbf16>
    %c12 = arith.constant 12 : index
    %c0_8 = arith.constant 0 : index
    %31 = vector.load %arg7[%c12, %c0_8] : memref<36x256xbf16, #tpu.memory_space<vmem>>, vector<4x256xbf16>
    tpu.vector_store %arg7[%c12, %c0_8], %30 {strides = array<i32>} : memref<36x256xbf16, #tpu.memory_space<vmem>>, vector<4x256xbf16>,
    %32 = arith.truncf %11 : vector<4x256xf32> to vector<4x256xbf16>
    %c16 = arith.constant 16 : index
    %c0_9 = arith.constant 0 : index
    %33 = vector.load %arg7[%c16, %c0_9] : memref<36x256xbf16, #tpu.memory_space<vmem>>, vector<4x256xbf16>
    tpu.vector_store %arg7[%c16, %c0_9], %32 {strides = array<i32>} : memref<36x256xbf16, #tpu.memory_space<vmem>>, vector<4x256xbf16>,
    %c255_i32 = arith.constant 255 : i32
    %34 = tpu.dynamic_rotate %11 by %c255_i32 dim 1 : vector<4x256xf32>, i32 -> vector<4x256xf32>
    %35 = vector.broadcast %5 : vector<1x256xf32> to vector<4x256xf32>
    %36 = arith.mulf %34, %35 : vector<4x256xf32>
    %37 = arith.truncf %36 : vector<4x256xf32> to vector<4x256xbf16>
    %c20 = arith.constant 20 : index
    %c0_10 = arith.constant 0 : index
    %38 = vector.load %arg7[%c20, %c0_10] : memref<36x256xbf16, #tpu.memory_space<vmem>>, vector<4x256xbf16>
    tpu.vector_store %arg7[%c20, %c0_10], %37 {strides = array<i32>} : memref<36x256xbf16, #tpu.memory_space<vmem>>, vector<4x256xbf16>,
    %c241_i32 = arith.constant 241 : i32
    %39 = tpu.dynamic_rotate %11 by %c241_i32 dim 1 : vector<4x256xf32>, i32 -> vector<4x256xf32>
    %40 = vector.broadcast %6 : vector<1x256xf32> to vector<4x256xf32>
    %41 = arith.mulf %39, %40 : vector<4x256xf32>
    %42 = arith.truncf %41 : vector<4x256xf32> to vector<4x256xbf16>
    %c24 = arith.constant 24 : index
    %c0_11 = arith.constant 0 : index
    %43 = vector.load %arg7[%c24, %c0_11] : memref<36x256xbf16, #tpu.memory_space<vmem>>, vector<4x256xbf16>
    tpu.vector_store %arg7[%c24, %c0_11], %42 {strides = array<i32>} : memref<36x256xbf16, #tpu.memory_space<vmem>>, vector<4x256xbf16>,
    %c240_i32 = arith.constant 240 : i32
    %44 = tpu.dynamic_rotate %11 by %c240_i32 dim 1 : vector<4x256xf32>, i32 -> vector<4x256xf32>
    %45 = vector.broadcast %7 : vector<1x256xf32> to vector<4x256xf32>
    %46 = arith.mulf %44, %45 : vector<4x256xf32>
    %47 = arith.truncf %46 : vector<4x256xf32> to vector<4x256xbf16>
    %c28 = arith.constant 28 : index
    %c0_12 = arith.constant 0 : index
    %48 = vector.load %arg7[%c28, %c0_12] : memref<36x256xbf16, #tpu.memory_space<vmem>>, vector<4x256xbf16>
    tpu.vector_store %arg7[%c28, %c0_12], %47 {strides = array<i32>} : memref<36x256xbf16, #tpu.memory_space<vmem>>, vector<4x256xbf16>,
    %c239_i32 = arith.constant 239 : i32
    %49 = tpu.dynamic_rotate %11 by %c239_i32 dim 1 : vector<4x256xf32>, i32 -> vector<4x256xf32>
    %50 = vector.broadcast %8 : vector<1x256xf32> to vector<4x256xf32>
    %51 = arith.mulf %49, %50 : vector<4x256xf32>
    %52 = arith.truncf %51 : vector<4x256xf32> to vector<4x256xbf16>
    %c32 = arith.constant 32 : index
    %c0_13 = arith.constant 0 : index
    %53 = vector.load %arg7[%c32, %c0_13] : memref<36x256xbf16, #tpu.memory_space<vmem>>, vector<4x256xbf16>
    tpu.vector_store %arg7[%c32, %c0_13], %52 {strides = array<i32>} : memref<36x256xbf16, #tpu.memory_space<vmem>>, vector<4x256xbf16>,
    %c0_14 = arith.constant 0 : index
    %c0_15 = arith.constant 0 : index
    %c256 = arith.constant 256 : index
    %54 = vector.load %arg6[%c0_14, %c0_15, %c256] : memref<1x8x512xf32, #tpu.memory_space<vmem>>, vector<1x8x256xf32>
    %55 = vector.shape_cast %54 : vector<1x8x256xf32> to vector<8x256xf32>
    %56 = vector.shape_cast %10 : vector<8x256xf32> to vector<1x8x256xf32>
    tpu.vector_store %arg6[%c0_14, %c0_15, %c256], %56 {strides = array<i32>} : memref<1x8x512xf32, #tpu.memory_space<vmem>>, vector<1x8x256xf32>,
    %c0_16 = arith.constant 0 : index
    %c0_17 = arith.constant 0 : index
    %57 = vector.load %arg2[%c0_16, %c0_17] : memref<8x36xbf16, #tpu.memory_space<vmem>>, vector<8x36xbf16>
    %c0_18 = arith.constant 0 : index
    %c0_19 = arith.constant 0 : index
    %58 = vector.load %arg7[%c0_18, %c0_19] : memref<36x256xbf16, #tpu.memory_space<vmem>>, vector<36x256xbf16>
    %cst = arith.constant dense<0.000000e+00> : vector<8x256xf32>
    %59 = tpu.matmul %57, %58, %cst {dimension_numbers = #tpu.dot_dimension_numbers<[1], [0], [0], [1], [0, 0, 1, 1], [], []>} : vector<8x36xbf16>, vector<36x256xbf16>, vector<8x256xf32> -> vector<8x256xf32>
    %c0_20 = arith.constant 0 : index
    %c0_21 = arith.constant 0 : index
    %60 = vector.load %arg4[%c0_20, %c0_21] : memref<8x1xf32, #tpu.memory_space<vmem>>, vector<8x1xf32>
    %61 = vector.broadcast %60 : vector<8x1xf32> to vector<8x256xf32>
    %62 = arith.mulf %59, %61 : vector<8x256xf32>
    %c0_22 = arith.constant 0 : index
    %c0_23 = arith.constant 0 : index
    %63 = vector.load %arg5[%c0_22, %c0_23] : memref<8x1xf32, #tpu.memory_space<vmem>>, vector<8x1xf32>
    %64 = vector.broadcast %63 : vector<8x1xf32> to vector<8x256xf32>
    %65 = arith.addf %62, %64 : vector<8x256xf32>
    %cst_24 = arith.constant -1.000000e+00 : f32
    %cst_25 = arith.constant 1.000000e+00 : f32
    %66 = vector.broadcast %cst_24 : f32 to vector<8x256xf32>
    %67 = arith.maximumf %66, %65 : vector<8x256xf32>
    %68 = vector.broadcast %cst_25 : f32 to vector<8x256xf32>
    %69 = arith.minimumf %68, %67 : vector<8x256xf32>
    %c0_26 = arith.constant 0 : index
    %c0_27 = arith.constant 0 : index
    %c0_28 = arith.constant 0 : index
    %70 = vector.load %arg6[%c0_26, %c0_27, %c0_28] : memref<1x8x512xf32, #tpu.memory_space<vmem>>, vector<1x8x256xf32>
    %71 = vector.shape_cast %70 : vector<1x8x256xf32> to vector<8x256xf32>
    %72 = vector.shape_cast %69 : vector<8x256xf32> to vector<1x8x256xf32>
    tpu.vector_store %arg6[%c0_26, %c0_27, %c0_28], %72 {strides = array<i32>} : memref<1x8x512xf32, #tpu.memory_space<vmem>>, vector<1x8x256xf32>,
    return
  }
  func.func @transform_0(%arg0: i32) -> (i32, i32, i32) {
    %c0_i32 = arith.constant 0 : i32
    %c0_i32_0 = arith.constant 0 : i32
    %c0_i32_1 = arith.constant 0 : i32
    return %arg0, %c0_i32, %c0_i32_0 : i32, i32, i32
  }
  func.func @transform_1(%arg0: i32) -> (i32, i32) {
    %c0_i32 = arith.constant 0 : i32
    %c0_i32_0 = arith.constant 0 : i32
    %c0_i32_1 = arith.constant 0 : i32
    return %c0_i32, %c0_i32_0 : i32, i32
  }
  func.func @transform_2(%arg0: i32) -> (i32, i32) {
    %c0_i32 = arith.constant 0 : i32
    %c0_i32_0 = arith.constant 0 : i32
    %c0_i32_1 = arith.constant 0 : i32
    return %c0_i32, %c0_i32_0 : i32, i32
  }
  func.func @transform_3(%arg0: i32) -> (i32, i32) {
    %c0_i32 = arith.constant 0 : i32
    %c0_i32_0 = arith.constant 0 : i32
    %c0_i32_1 = arith.constant 0 : i32
    return %c0_i32, %c0_i32_0 : i32, i32
  }
  func.func @transform_4(%arg0: i32) -> (i32, i32) {
    %c0_i32 = arith.constant 0 : i32
    %c0_i32_0 = arith.constant 0 : i32
    %c0_i32_1 = arith.constant 0 : i32
    return %c0_i32, %c0_i32_0 : i32, i32
  }
  func.func @transform_5(%arg0: i32) -> (i32, i32, i32) {
    %c0_i32 = arith.constant 0 : i32
    %c0_i32_0 = arith.constant 0 : i32
    %c0_i32_1 = arith.constant 0 : i32
    return %arg0, %c0_i32, %c0_i32_0 : i32, i32, i32
  }
}

</mosaic_0001>

<bundles_post_ra>
// kernel: _lambda_.1
= control target key start
LH: loop header
LB: loop body
LE: loop exit
PB: predicated region body
PF: predicated region fallthrough
CT: control target
= control target key end

     0   :  { %s605_s18 = smov 0   ;;  %s707_s0 = inlined_call_operand.vmem [shape: f32[2,8,256], index: 0, kind: input, shape index: {}]   ;;  %s708_s1 = inlined_call_operand.vmem [shape: bf16[8,36], index: 1, kind: input, shape index: {}]   ;;  %s709_s2 = inlined_call_operand.vmem [shape: f32[9,256], index: 2, kind: input, shape index: {}]   ;;  %s710_s3 = inlined_call_operand.vmem [shape: f32[8,1], index: 3, kind: input, shape index: {}]   ;;  %s711_s4 = inlined_call_operand.vmem [shape: f32[8,1], index: 4, kind: input, shape index: {}]   ;;  %s712_s5 = inlined_call_operand.vmem [shape: f32[2,8,512], index: 5, kind: output, shape index: {}]  }
   0x1 LB: > { %s499_s19 = sadd.s32 4294967295, %s564_s18   ;;  %p503_p0 = scmp.ge.s32.totalorder %s564_s18, 1  ;;  %s564_s18 = sphi %s605_s18, %s15_s18  }
   0x2   : > { %p187_p1 = scmp.lt.s32.totalorder %s564_s18, 3 }
   0x4   : > { %p188_p2 = pnand %p503_p0, %p187_p1 }
   0x5   : > { %p215_p3 = scmp.lt.s32.totalorder (!%p188_p2), %s499_s19, 1  ;;  %s566_s24 = smov (!%p188_p2), 127  }
   0x6   : > { %191 = sbr.rel (%p188_p2) target bundleno = 322 (0x142), region = 40  ;;  %s567_s25 = smov (!%p188_p2), 111  }
   0x7   : > { %s568_s26 = smov (!%p188_p2), 112   ;;  %s569_s27 = smov (!%p188_p2), 113  }
   0x8   : > { %s570_s28 = smov (!%p188_p2), 16   ;;  %s571_s29 = smov (!%p188_p2), 1  }
   0x9   : > { %s572_s30 = smov (!%p188_p2), 17   ;;  %s573_s6 = smov (!%p188_p2), 15  }
   0xb   : > { %s714_s19 = smov (!%p215_p3, %s499_s19), 1  ;;  %v236_v2 = vlaneseq  ;;  %v644_v5 = vld [vmem:[%s709_s2] sm:$0xff]  ;;  %v649_v6 = vld [vmem:[%s709_s2 + $0x8] sm:$0xff]  ;;  %v556_v21 = vld [vmem:[%s709_s2 + $0x10] ss:$0 sm:$0xff]  ;;  %vm389_vm6 = vcmask 1041408  }
   0xc   : > { %s530_s20 = sshll.u32 %s714_s19, 4  ;;  %v330_v8 = vperm.slane %v644_v5, 7  ;;  %v331_v9 = vperm.slane %v649_v6, 7  ;;  %v301_v19 = vperm.slane %v644_v5, 5  ;;  %v302_v20 = vperm.slane %v649_v6, 5 }
   0xd   : > { %s219_s23 = scalar_lea.vmem %s707_s0, %s530_s20  ;;  %v639_v4 = vand.u32 127, %v236_v2  ;;  %v557_v22 = vld [vmem:[%s709_s2 + $0x18] ss:$0 sm:$0xff]  ;;  %v317_v37 = vperm.slane %v644_v5, 6  ;;  %v318_v38 = vperm.slane %v649_v6, 6  ;;  %v254_v46 = vperm.slane %v644_v5, 1 }
   0xe   : > { %v619_v0 = vld [vmem:[%s219_s23] sm:$0xff]  ;;  %v624_v1 = vld [vmem:[%s219_s23 + $0x8] sm:$0xff]  ;;  %v255_v48 = vperm.slane %v649_v6, 1  ;;  %v283_v52 = vperm.slane %v644_v5, 3  ;;  %v284_v53 = vperm.slane %v649_v6, 3  ;;  %vm385_vm9 = vcmask 293888  }
   0xf   : > { %294 = vrot.lane.b32.xlu1 %v619_v0, %s566_s24  ;;  %339 = vrot.lane.b32.xlu0 %v619_v0, %s567_s25  ;;  %v292_v7 = vpack.c.bf16 %v624_v1, %v619_v0  ;;  %vm327_vm0 = vcmp.lt.s32.totalorder %v639_v4, 112  ;;  %vm298_vm1 = vcmp.lt.s32.totalorder %v639_v4, 127  ;;  %vm343_vm2 = vcmp.lt.s32.totalorder %v639_v4, 111  ;;  %s531_s23 = sshll.u32 %s714_s19, 5 }
  0x10   : > { %323 = vrot.lane.b32.xlu2 %v619_v0, %s568_s26  ;;  %vm314_vm3 = vcmp.lt.s32.totalorder %v639_v4, 113  ;;  %vm251_vm4 = vcmp.lt.s32.totalorder %v639_v4, 16  ;;  %vm280_vm5 = vcmp.lt.s32.totalorder %v639_v4, 1  ;;  %vm238_vm7 = vcmp.lt.s32.totalorder %v639_v4, 17 }
  0x11   : > { %293 = vst [vmem:[#allocation2 + $0x10] sm:$0x33] %v292_v7  ;;  %vm267_vm8 = vcmp.lt.s32.totalorder %v639_v4, 15  ;;  %v354_v4 = vld [vmem:[%s708_s1] sm:$0xf] }
  0x17   : > { %296 = vrot.lane.b32.xlu1 %v624_v1, %s566_s24  ;;  %341 = vrot.lane.b32.xlu0 %v624_v1, %s567_s25 }
  0x18   : > { %325 = vrot.lane.b32.xlu2 %v624_v1, %s568_s26  ;;  %s224_s26 = scalar_lea.vmem %s712_s5, %s531_s23 }
  0x19   : > { %353 = vst [vmem:[%s224_s26 + $0x18] sm:$0xff] %v624_v1 }
  0x1a   : > { %352 = vst [vmem:[%s224_s26 + $0x10] sm:$0xff] %v619_v0 }
  0x1f   : > { %312 = vrot.lane.b32.xlu1 %v624_v1, %s569_s27  ;;  %310 = vrot.lane.b32.xlu0 %v619_v0, %s569_s27 }
  0x20   : > { %247 = vrot.lane.b32.xlu2 %v619_v0, %s570_s28 }
  0x27   : > { %276 = vrot.lane.b32.xlu1 %v619_v0, %s571_s29  ;;  %249 = vrot.lane.b32.xlu0 %v624_v1, %s570_s28 }
  0x28   : > { %278 = vrot.lane.b32.xlu2 %v624_v1, %s571_s29 }
  0x2f   : > { %234 = vrot.lane.b32.xlu1 %v624_v1, %s572_s30  ;;  %232 = vrot.lane.b32.xlu0 %v619_v0, %s572_s30 }
  0x30   : > { %263 = vrot.lane.b32.xlu2 %v619_v0, %s573_s6 }
  0x37   : > { %265 = vrot.lane.b32.xlu0 %v624_v1, %s573_s6 }
  0x6a   : > { %v324_v3 = vpop.permute.xlu2 %323 }
  0x72   : > { %v326_v10 = vpop.permute.xlu2 %325 }
  0x73   : > { %v328_v11 = vsel %vm327_vm0, %v324_v3, %v326_v10  ;;  %v329_v12 = vsel %vm327_vm0, %v326_v10, %v324_v3  ;;  %v430_v10 = vld [vmem:[%s711_s4] sm:$0xff] }
  0x74   : > { %v332_v13 = vmul.f32 %v330_v8, %v328_v11  ;;  %v333_v14 = vmul.f32 %v331_v9, %v329_v12  ;;  %v422_v9 = vld [vmem:[%s710_s3] sm:$0xff]  ;;  %v241_v12 = vperm.slane %v644_v5, 0 }
  0x76   : > { %v334_v15 = vpack.c.bf16 %v333_v14, %v332_v13  ;;  %v574_v14 = vmov 0  }
  0x77   : > { %553 = vset.pattern.permute.xlu1 %v574_v14  ;;  %554 = vset.pattern.permute.xlu2 %v574_v14 }
  0x78   : > { %v336_v16 = vrot.slane %v334_v15, 6  ;;  %425 = vperm.xlu1 %553, %v422_v9   ;;  %433 = vperm.xlu2 %554, %v430_v10  }
  0x79   : > { %555 = vset.pattern.permute.xlu0 %v574_v14 }
  0x7a   : > { %338 = vst [vmem:[#allocation2 + $0x18] sm:$0xcc] %v336_v16  ;;  %v248_v35 = vpop.permute.xlu2 %247 }
  0x81   : > { %v295_v17 = vpop.permute.xlu1 %294  ;;  %v340_v18 = vpop.permute.xlu0 %339 }
  0x82   : > { %v279_v51 = vpop.permute.xlu2 %278 }
  0x89   : > { %v297_v23 = vpop.permute.xlu1 %296  ;;  %v342_v24 = vpop.permute.xlu0 %341 }
  0x8a   : > { %v299_v25 = vsel %vm298_vm1, %v295_v17, %v297_v23  ;;  %v300_v26 = vsel %vm298_vm1, %v297_v23, %v295_v17  ;;  %v344_v27 = vsel %vm343_vm2, %v340_v18, %v342_v24  ;;  %v345_v28 = vsel %vm343_vm2, %v342_v24, %v340_v18 }
  0x8b   : > { %v303_v29 = vmul.f32 %v301_v19, %v299_v25  ;;  %v304_v30 = vmul.f32 %v302_v20, %v300_v26  ;;  %v348_v31 = vmul.f32 %v556_v21, %v344_v27  ;;  %v349_v32 = vmul.f32 %v557_v22, %v345_v28 }
  0x8c   : > { %v242_v20 = vperm.slane %v649_v6, 0 }
  0x8d   : > { %v305_v33 = vpack.c.bf16 %v304_v30, %v303_v29  ;;  %v350_v34 = vpack.c.bf16 %v349_v32, %v348_v31  ;;  %v264_v31 = vpop.permute.xlu2 %263  ;;  %v270_v32 = vperm.slane %v644_v5, 2 }
  0x8f   : > { %v307_v36 = vrot.slane %v305_v33, 6  ;;  %351 = vst [vmem:[#allocation2 + $0x20] sm:$0x33] %v350_v34  ;;  %v271_v33 = vperm.slane %v649_v6, 2 }
  0x91   : > { %309 = vst [vmem:[#allocation2 + $0x10] sm:$0xcc] %v307_v36  ;;  %v313_v39 = vpop.permute.xlu1 %312  ;;  %v311_v40 = vpop.permute.xlu0 %310 }
  0x92   : > { %v315_v41 = vsel %vm314_vm3, %v311_v40, %v313_v39  ;;  %v316_v42 = vsel %vm314_vm3, %v313_v39, %v311_v40 }
  0x93   : > { %v319_v43 = vmul.f32 %v317_v37, %v315_v41  ;;  %v320_v44 = vmul.f32 %v318_v38, %v316_v42 }
  0x95   : > { %v321_v45 = vpack.c.bf16 %v320_v44, %v319_v43 }
  0x96   : > { %v359_v47 = vld [vmem:[#allocation2 + $0x20] sm:$0x33] }
  0x97   : > { %322 = vst [vmem:[#allocation2 + $0x18] sm:$0x33] %v321_v45  ;;  %v373_v49 = vunpack.c.l.b16 %v359_v47  ;;  %v374_v50 = vunpack.c.h.b16 %v359_v47 }
  0x98   : > { %v518_v13 = vld [vmem:[#allocation2 + $0x10] sm:$0xf]  ;;  %v534_v17 = vld [vmem:[#allocation2 + $0x14] sm:$0xf] }
  0x99   : > { %v277_v54 = vpop.permute.xlu1 %276  ;;  %v250_v55 = vpop.permute.xlu0 %249  ;;  %v379_v56 = vpack.c.b16 %v373_v49, %v373_v49  ;;  %v380_v57 = vpack.c.b16 %v374_v50, %v374_v50 }
  0x9a   : > { %v252_v58 = vsel %vm251_vm4, %v248_v35, %v250_v55  ;;  %v253_v59 = vsel %vm251_vm4, %v250_v55, %v248_v35  ;;  %v281_v60 = vsel %vm280_vm5, %v277_v54, %v279_v51  ;;  %v282_v61 = vsel %vm280_vm5, %v279_v51, %v277_v54 }
  0x9b   : > { %v256_v62 = vmul.f32 %v254_v46, %v253_v59  ;;  %v257_v63 = vmul.f32 %v255_v48, %v252_v58  ;;  %v391_v2 = vsel %vm389_vm6, %v379_v56, 0  ;;  %v394_v3 = vsel %vm389_vm6, %v380_v57, 0 }
  0x9c   : > { %401 = vmatpush.bf16.msra.mxu0 %v391_v2  ;;  %414 = vmatpush.bf16.msra.mxu1 %v394_v3  ;;  %v285_v7 = vmul.f32 %v283_v52, %v282_v61  ;;  %v286_v8 = vmul.f32 %v284_v53, %v281_v60 }
  0x9d   : > { %v258_v11 = vpack.c.bf16 %v257_v63, %v256_v62 }
  0x9e   : > { %v287_v15 = vpack.c.bf16 %v286_v8, %v285_v7  ;;  %v535_v16 = vld [vmem:[#allocation2 + $0x14] sm:$0xf0]  ;;  %v520_v18 = vld [vmem:[#allocation2 + $0x18] sm:$0xf0] }
  0x9f   : > { %v260_v19 = vrot.slane %v258_v11, 6  ;;  %v519_v21 = vor.u32 %v535_v16, %v518_v13  ;;  %v523_v22 = vor.u32 %v534_v17, %v520_v18 }
  0xa0   : > { %v289_v23 = vrot.slane %v287_v15, 6 }
  0xa1   : > { %262 = vst [vmem:[#allocation2] sm:$0xcc] %v260_v19  ;;  %v235_v24 = vpop.permute.xlu1 %234  ;;  %v233_v25 = vpop.permute.xlu0 %232  ;;  %402 = vmatpush.bf16.msra.mxu0 %v519_v21  ;;  %415 = vmatpush.bf16.msra.mxu1 %v523_v22 }
  0xa2   : > { %291 = vst [vmem:[#allocation2 + $0x8] sm:$0xcc] %v289_v23  ;;  %v239_v26 = vsel %vm238_vm7, %v233_v25, %v235_v24  ;;  %v240_v27 = vsel %vm238_vm7, %v235_v24, %v233_v25 }
  0xa3   : > { %v243_v28 = vmul.f32 %v241_v12, %v240_v27  ;;  %v244_v29 = vmul.f32 %v242_v20, %v239_v26 }
  0xa5   : > { %v245_v30 = vpack.c.bf16 %v244_v29, %v243_v28 }
  0xa7   : > { %246 = vst [vmem:[#allocation2] sm:$0x33] %v245_v30 }
  0xa9   : > { %v266_v34 = vpop.permute.xlu0 %265 }
  0xaa   : > { %v268_v35 = vsel %vm267_vm8, %v264_v31, %v266_v34  ;;  %v269_v36 = vsel %vm267_vm8, %v266_v34, %v264_v31 }
  0xab   : > { %v272_v37 = vmul.f32 %v270_v32, %v269_v36  ;;  %v273_v38 = vmul.f32 %v271_v33, %v268_v35 }
  0xad   : > { %v274_v39 = vpack.c.bf16 %v273_v38, %v272_v37 }
  0xae   : > { %v510_v40 = vld [vmem:[#allocation2] sm:$0xf]  ;;  %v532_v42 = vld [vmem:[#allocation2 + $0x4] sm:$0xf] }
  0xaf   : > { %275 = vst [vmem:[#allocation2 + $0x8] sm:$0x33] %v274_v39 }
  0xb6   : > { %v533_v41 = vld [vmem:[#allocation2 + $0x4] sm:$0xf0]  ;;  %v512_v43 = vld [vmem:[#allocation2 + $0x8] sm:$0xf0] }
  0xb7   : > { %v511_v44 = vor.u32 %v533_v41, %v510_v40  ;;  %v515_v45 = vor.u32 %v532_v42, %v512_v43 }
  0xb9   : > { %403 = vmatpush.bf16.msra.mxu0 %v511_v44  ;;  %416 = vmatpush.bf16.msra.mxu1 %v515_v45 }
  0xbc   : > { %524 = vmatmul.msk.bf16.vlgmr.msra.gmra.mxu0 %vm385_vm9, %v354_v4  ;;  %525 = vmatmul.msk.bf16.vlgmr.msra.gmra.mxu1 %vm385_vm9, %v354_v4 }
  0xd2   : > { %v434_v6 = vpop.permute.xlu2 %433 }
  0xea   : > { %v426_v5 = vpop.permute.xlu1 %425 }
 0x139   : > { %v405_v46 = vpop.f32.mrf.mxu0  ;;  %v418_v47 = vpop.f32.mrf.mxu1 }
 0x13a   : > { %v428_v48 = vmul.f32 %v426_v5, %v405_v46  ;;  %v429_v49 = vmul.f32 %v426_v5, %v418_v47 }
 0x13c   : > { %v436_v50 = vadd.f32 %v434_v6, %v428_v48  ;;  %v437_v51 = vadd.f32 %v434_v6, %v429_v49 }
 0x13e   : > { %v526_v52 = vclamps-f32 %v436_v50, 1.0  ;;  %v527_v53 = vclamps-f32 %v437_v51, 1.0 }
 0x140   : > { %442 = vst [vmem:[%s224_s26] sm:$0xff] %v526_v52 }
 0x141   : > { %443 = vst [vmem:[%s224_s26 + $0x8] sm:$0xff] %v527_v53  ;;  %v407_v54 = vpop.f32.mrf.mxu0  ;;  %v420_v55 = vpop.f32.mrf.mxu1 }
 0x142 PF: > { %s15_s18 = sadd.s32 1, %s564_s18  }
 0x143   : > { %p12_p4 = scmp.ge.s32.totalorder %s15_s18, 4  }
 0x145   :  { %14 = sbr.rel (!%p12_p4) target bundleno = 1 (0x1), region = 70 }

</bundles_post_ra>
